<compile_context>
chip_gen: v5e
topology: v5e:2x2
jax: 0.10.0
libtpu: 0.0.40
codegen_flags: <defaults>
</compile_context>

<pallas_src>
import functools

import jax
import jax.numpy as jnp
from jax.experimental import pallas as pl
from jax.experimental.pallas import tpu as pltpu

_LANE = 128      # lane width (last-dim alignment)
_SUBLANE = 8     # sublane width (second-to-last alignment, f32)


def _round_up(x, m):
    return ((x + m - 1) // m) * m


# ---------------------------------------------------------------------------
# Kernel
# ---------------------------------------------------------------------------
def _make_densenet_kernel(apply_act):
    """Fused chain of Linear(+ReLU) layers over one [TB, width] batch tile."""
    n_layers = len(apply_act)

    def kernel(x_ref, *refs):
        # refs layout: w0, b0, w1, b1, ..., w_{n-1}, b_{n-1}, out_ref
        w_refs = refs[0:2 * n_layers:2]
        b_refs = refs[1:2 * n_layers:2]
        out_ref = refs[2 * n_layers]

        h = x_ref[...]
        for i in range(n_layers):
            # MXU matmul with f32 accumulation; inputs fed in their native
            # dtype (bf16 goes straight to the MXU's bf16 path).
            h = jnp.dot(h, w_refs[i][...], preferred_element_type=jnp.float32)
            h = h + b_refs[i][...]          # broadcast over batch rows (f32)
            if apply_act[i]:
                h = jnp.maximum(h, 0.0)     # nn.ReLU
        out_ref[...] = h.astype(out_ref.dtype)

    return kernel


# ---------------------------------------------------------------------------
# Wrapper
# ---------------------------------------------------------------------------
def _pick_batch_tile(batch, max_width_pad, itemsize):
    """Largest batch tile such that ~4 live [TB, max_width] buffers
    (double-buffered in/out activation tiles) stay under a conservative
    budget that also fits v7x's smaller VMEM."""
    budget_bytes = 8 << 20  # 8 MiB of activation tiles; weights live on top
    tb = 512
    while tb > _SUBLANE and 4 * tb * max_width_pad * itemsize > budget_bytes:
        tb //= 2
    if batch < tb:
        tb = max(_SUBLANE, _round_up(batch, _SUBLANE))
    return tb


def densenet_forward(x, weights, biases, apply_act, batch_tile=None):
    """Fused DenseNet forward pass in one pallas_call.

    x:         [batch, encoder_widths[0]]
    weights:   list of [in_i, out_i]  (pre-transposed PyTorch Linear weights)
    biases:    list of [1, out_i]
    apply_act: tuple of bools (static) — ReLU after layer i or not.
    batch_tile: optional static override of the batch tile size.
    """
    n_layers = len(weights)
    assert len(biases) == n_layers and len(apply_act) == n_layers

    batch, in_dim = x.shape
    out_dim = weights[-1].shape[1]
    itemsize = jnp.dtype(x.dtype).itemsize

    # ---- lane-dense zero padding of every feature dimension ---------------
    # Zero-padded rows/cols of W and zero-padded bias entries keep the padded
    # lanes exactly zero through every layer (ReLU preserves zeros), so the
    # math on the real lanes is unchanged; we slice the padding off at the end.
    widths = [in_dim] + [w.shape[1] for w in weights]
    widths_pad = [_round_up(w, _LANE) for w in widths]

    w_pad, b_pad = [], []
    for i, (w, b) in enumerate(zip(weights, biases)):
        w_pad.append(jnp.pad(w, ((0, widths_pad[i] - w.shape[0]),
                                 (0, widths_pad[i + 1] - w.shape[1]))))
        b_pad.append(jnp.pad(b, ((0, 0),
                                 (0, widths_pad[i + 1] - b.shape[1]))))

    max_width_pad = max(widths_pad)
    tb = batch_tile if batch_tile is not None else _pick_batch_tile(
        batch, max_width_pad, itemsize)
    tb = max(_SUBLANE, _round_up(tb, _SUBLANE))
    batch_pad = _round_up(batch, tb)

    x_pad = jnp.pad(x, ((0, batch_pad - batch), (0, widths_pad[0] - in_dim)))

    # ---- grid / specs ------------------------------------------------------
    grid = (pl.cdiv(batch_pad, tb),)

    # Activation tile streams over the batch grid (double-buffered by Pallas);
    # weights & biases map to block (0, 0) every step -> stay VMEM-resident.
    in_specs = [pl.BlockSpec((tb, widths_pad[0]), lambda i: (i, 0))]
    operands = [x_pad]
    for k in range(n_layers):
        in_specs.append(pl.BlockSpec((widths_pad[k], widths_pad[k + 1]),
                                     lambda i: (0, 0)))
        in_specs.append(pl.BlockSpec((1, widths_pad[k + 1]),
                                     lambda i: (0, 0)))
        operands.append(w_pad[k])
        operands.append(b_pad[k])

    out_specs = pl.BlockSpec((tb, widths_pad[-1]), lambda i: (i, 0))

    # ---- explicit VMEM budget (sized against v7x: 64 MiB phys / 32 default)
    param_bytes = sum(int(a.size) * a.dtype.itemsize for a in w_pad + b_pad)
    act_bytes = 2 * tb * (widths_pad[0] + widths_pad[-1]) * itemsize  # dbl-buf
    scratch_bytes = 4 * tb * max_width_pad * 4                        # f32 temps
    vmem_limit = int(2 * (param_bytes + act_bytes + scratch_bytes))
    vmem_limit = max(16 << 20, min(vmem_limit, 48 << 20))

    kernel = _make_densenet_kernel(tuple(apply_act))

    out = pl.pallas_call(
        kernel,
        out_shape=jax.ShapeDtypeStruct((batch_pad, widths_pad[-1]), x.dtype),
        grid=grid,
        in_specs=in_specs,
        out_specs=out_specs,
        compiler_params=pltpu.CompilerParams(
            dimension_semantics=("parallel",),   # shard batch across TCs
            vmem_limit_bytes=vmem_limit),
    )(*operands)

    return out[:batch, :out_dim]


# ---------------------------------------------------------------------------
# Params + reference
# ---------------------------------------------------------------------------
def build_densenet_params(key, encoder_widths, decoder_widths, dtype=jnp.float32):
    """Deterministic init mimicking PyTorch nn.Linear defaults
    (uniform in [-1/sqrt(fan_in), 1/sqrt(fan_in)])."""
    assert encoder_widths[-1] == decoder_widths[0], \
        'encoder output and decoder input dims must match'
    widths = list(encoder_widths) + list(decoder_widths[1:])
    weights, biases = [], []
    for k in range(len(widths) - 1):
        fan_in, fan_out = widths[k], widths[k + 1]
        key, kw, kb = jax.random.split(key, 3)
        bound = 1.0 / jnp.sqrt(jnp.asarray(fan_in, jnp.float32))
        # Stored already transposed: [in, out]  (PyTorch stores [out, in]).
        w = jax.random.uniform(kw, (fan_in, fan_out), dtype,
                               minval=-bound, maxval=bound)
        b = jax.random.uniform(kb, (1, fan_out), dtype,
                               minval=-bound, maxval=bound)
        weights.append(w)
        biases.append(b)

    n_enc = len(encoder_widths) - 1
    n_dec = len(decoder_widths) - 1
    # ReLU after every encoder layer except the last; ReLU after every decoder
    # layer except the last (out_fn=None -> identity on final output).
    apply_act = tuple(
        [k != n_enc - 1 for k in range(n_enc)] +
        [k != n_dec - 1 for k in range(n_dec)]
    )
    return weights, biases, apply_act


def densenet_reference(x, weights, biases, apply_act):
    """Pure-JAX reference matching the PyTorch forward exactly."""
    h = x.astype(jnp.float32)
    for w, b, act in zip(weights, biases, apply_act):
        h = h @ w.astype(jnp.float32) + b.astype(jnp.float32)
        if act:
            h = jnp.maximum(h, 0.0)
    return h.astype(x.dtype)


# ---------------------------------------------------------------------------
if __name__ == "__main__":
    # Small fully-connected autoencoder shapes.
    encoder_widths = [16, 32, 8]   # 16 -> 32 -> 8   (latent = 8)
    decoder_widths = [8, 32, 16]   # 8  -> 32 -> 16
    batch = 32                     # small, but multi-tile with batch_tile=8

    key = jax.random.PRNGKey(0)
    key, kx = jax.random.split(key)
    x = jax.random.normal(kx, (batch, encoder_widths[0]), jnp.float32)

    weights, biases, apply_act = build_densenet_params(
        key, encoder_widths, decoder_widths)

    # batch_tile=8 forces a 4-step batch grid at these toy sizes; for real
    # workloads leave batch_tile=None and the wrapper picks >=512 rows.
    run = jax.jit(functools.partial(densenet_forward,
                                    apply_act=apply_act, batch_tile=8))
    out = jax.block_until_ready(run(x, weights, biases))

    ref = densenet_reference(x, weights, biases, apply_act)
    assert out.shape == (batch, decoder_widths[-1])
    assert jnp.allclose(out, ref, atol=1e-5, rtol=1e-5), "mismatch vs reference"

    print("KERNEL_OK")
</pallas_src>

<mosaic_0001>
module attributes {stable_mosaic.version = 11 : i64} {
  func.func @kernel(%arg0: i32, %arg1: memref<8x128xf32, #tpu.memory_space<vmem>>, %arg2: memref<128x128xf32, #tpu.memory_space<vmem>>, %arg3: memref<1x128xf32, #tpu.memory_space<vmem>>, %arg4: memref<128x128xf32, #tpu.memory_space<vmem>>, %arg5: memref<1x128xf32, #tpu.memory_space<vmem>>, %arg6: memref<128x128xf32, #tpu.memory_space<vmem>>, %arg7: memref<1x128xf32, #tpu.memory_space<vmem>>, %arg8: memref<128x128xf32, #tpu.memory_space<vmem>>, %arg9: memref<1x128xf32, #tpu.memory_space<vmem>>, %arg10: memref<8x128xf32, #tpu.memory_space<vmem>>) attributes {dimension_semantics = [#tpu.dimension_semantics<parallel>], iteration_bounds = array<i64: 4>, scalar_prefetch = 0 : i64, scratch_operands = 0 : i64, tpu.core_type = #tpu.core_type<tc>, window_params = [{transform_indices = @transform_0, window_bounds = array<i64: 8, 128>}, {pipeline_mode = #tpu.pipeline_mode<synchronous>, transform_indices = @transform_1, window_bounds = array<i64: 128, 128>}, {pipeline_mode = #tpu.pipeline_mode<synchronous>, transform_indices = @transform_2, window_bounds = array<i64: 1, 128>}, {pipeline_mode = #tpu.pipeline_mode<synchronous>, transform_indices = @transform_3, window_bounds = array<i64: 128, 128>}, {pipeline_mode = #tpu.pipeline_mode<synchronous>, transform_indices = @transform_4, window_bounds = array<i64: 1, 128>}, {pipeline_mode = #tpu.pipeline_mode<synchronous>, transform_indices = @transform_5, window_bounds = array<i64: 128, 128>}, {pipeline_mode = #tpu.pipeline_mode<synchronous>, transform_indices = @transform_6, window_bounds = array<i64: 1, 128>}, {pipeline_mode = #tpu.pipeline_mode<synchronous>, transform_indices = @transform_7, window_bounds = array<i64: 128, 128>}, {pipeline_mode = #tpu.pipeline_mode<synchronous>, transform_indices = @transform_8, window_bounds = array<i64: 1, 128>}, {transform_indices = @transform_9, window_bounds = array<i64: 8, 128>}]} {
    %c0 = arith.constant 0 : index
    %c0_0 = arith.constant 0 : index
    %0 = vector.load %arg1[%c0, %c0_0] : memref<8x128xf32, #tpu.memory_space<vmem>>, vector<8x128xf32>
    %c0_1 = arith.constant 0 : index
    %c0_2 = arith.constant 0 : index
    %1 = vector.load %arg2[%c0_1, %c0_2] : memref<128x128xf32, #tpu.memory_space<vmem>>, vector<128x128xf32>
    %cst = arith.constant dense<0.000000e+00> : vector<8x128xf32>
    %2 = tpu.matmul %0, %1, %cst {dimension_numbers = #tpu.dot_dimension_numbers<[1], [0], [0], [1], [0, 0, 1, 1], [], []>} : vector<8x128xf32>, vector<128x128xf32>, vector<8x128xf32> -> vector<8x128xf32>
    %c0_3 = arith.constant 0 : index
    %c0_4 = arith.constant 0 : index
    %3 = vector.load %arg3[%c0_3, %c0_4] : memref<1x128xf32, #tpu.memory_space<vmem>>, vector<1x128xf32>
    %4 = vector.broadcast %3 : vector<1x128xf32> to vector<8x128xf32>
    %5 = arith.addf %2, %4 : vector<8x128xf32>
    %cst_5 = arith.constant 0.000000e+00 : f32
    %6 = vector.broadcast %cst_5 : f32 to vector<8x128xf32>
    %7 = arith.maximumf %5, %6 : vector<8x128xf32>
    %c0_6 = arith.constant 0 : index
    %c0_7 = arith.constant 0 : index
    %8 = vector.load %arg4[%c0_6, %c0_7] : memref<128x128xf32, #tpu.memory_space<vmem>>, vector<128x128xf32>
    %cst_8 = arith.constant dense<0.000000e+00> : vector<8x128xf32>
    %9 = tpu.matmul %7, %8, %cst_8 {dimension_numbers = #tpu.dot_dimension_numbers<[1], [0], [0], [1], [0, 0, 1, 1], [], []>} : vector<8x128xf32>, vector<128x128xf32>, vector<8x128xf32> -> vector<8x128xf32>
    %c0_9 = arith.constant 0 : index
    %c0_10 = arith.constant 0 : index
    %10 = vector.load %arg5[%c0_9, %c0_10] : memref<1x128xf32, #tpu.memory_space<vmem>>, vector<1x128xf32>
    %11 = vector.broadcast %10 : vector<1x128xf32> to vector<8x128xf32>
    %12 = arith.addf %9, %11 : vector<8x128xf32>
    %c0_11 = arith.constant 0 : index
    %c0_12 = arith.constant 0 : index
    %13 = vector.load %arg6[%c0_11, %c0_12] : memref<128x128xf32, #tpu.memory_space<vmem>>, vector<128x128xf32>
    %cst_13 = arith.constant dense<0.000000e+00> : vector<8x128xf32>
    %14 = tpu.matmul %12, %13, %cst_13 {dimension_numbers = #tpu.dot_dimension_numbers<[1], [0], [0], [1], [0, 0, 1, 1], [], []>} : vector<8x128xf32>, vector<128x128xf32>, vector<8x128xf32> -> vector<8x128xf32>
    %c0_14 = arith.constant 0 : index
    %c0_15 = arith.constant 0 : index
    %15 = vector.load %arg7[%c0_14, %c0_15] : memref<1x128xf32, #tpu.memory_space<vmem>>, vector<1x128xf32>
    %16 = vector.broadcast %15 : vector<1x128xf32> to vector<8x128xf32>
    %17 = arith.addf %14, %16 : vector<8x128xf32>
    %cst_16 = arith.constant 0.000000e+00 : f32
    %18 = vector.broadcast %cst_16 : f32 to vector<8x128xf32>
    %19 = arith.maximumf %17, %18 : vector<8x128xf32>
    %c0_17 = arith.constant 0 : index
    %c0_18 = arith.constant 0 : index
    %20 = vector.load %arg8[%c0_17, %c0_18] : memref<128x128xf32, #tpu.memory_space<vmem>>, vector<128x128xf32>
    %cst_19 = arith.constant dense<0.000000e+00> : vector<8x128xf32>
    %21 = tpu.matmul %19, %20, %cst_19 {dimension_numbers = #tpu.dot_dimension_numbers<[1], [0], [0], [1], [0, 0, 1, 1], [], []>} : vector<8x128xf32>, vector<128x128xf32>, vector<8x128xf32> -> vector<8x128xf32>
    %c0_20 = arith.constant 0 : index
    %c0_21 = arith.constant 0 : index
    %22 = vector.load %arg9[%c0_20, %c0_21] : memref<1x128xf32, #tpu.memory_space<vmem>>, vector<1x128xf32>
    %23 = vector.broadcast %22 : vector<1x128xf32> to vector<8x128xf32>
    %24 = arith.addf %21, %23 : vector<8x128xf32>
    %c0_22 = arith.constant 0 : index
    %c0_23 = arith.constant 0 : index
    %25 = vector.load %arg10[%c0_22, %c0_23] : memref<8x128xf32, #tpu.memory_space<vmem>>, vector<8x128xf32>
    tpu.vector_store %arg10[%c0_22, %c0_23], %24 {strides = array<i32>} : memref<8x128xf32, #tpu.memory_space<vmem>>, vector<8x128xf32>,
    return
  }
  func.func @transform_0(%arg0: i32) -> (i32, i32) {
    %c0_i32 = arith.constant 0 : i32
    %c0_i32_0 = arith.constant 0 : i32
    return %arg0, %c0_i32 : i32, i32
  }
  func.func @transform_1(%arg0: i32) -> (i32, i32) {
    %c0_i32 = arith.constant 0 : i32
    %c0_i32_0 = arith.constant 0 : i32
    %c0_i32_1 = arith.constant 0 : i32
    return %c0_i32, %c0_i32_0 : i32, i32
  }
  func.func @transform_2(%arg0: i32) -> (i32, i32) {
    %c0_i32 = arith.constant 0 : i32
    %c0_i32_0 = arith.constant 0 : i32
    %c0_i32_1 = arith.constant 0 : i32
    return %c0_i32, %c0_i32_0 : i32, i32
  }
  func.func @transform_3(%arg0: i32) -> (i32, i32) {
    %c0_i32 = arith.constant 0 : i32
    %c0_i32_0 = arith.constant 0 : i32
    %c0_i32_1 = arith.constant 0 : i32
    return %c0_i32, %c0_i32_0 : i32, i32
  }
  func.func @transform_4(%arg0: i32) -> (i32, i32) {
    %c0_i32 = arith.constant 0 : i32
    %c0_i32_0 = arith.constant 0 : i32
    %c0_i32_1 = arith.constant 0 : i32
    return %c0_i32, %c0_i32_0 : i32, i32
  }
  func.func @transform_5(%arg0: i32) -> (i32, i32) {
    %c0_i32 = arith.constant 0 : i32
    %c0_i32_0 = arith.constant 0 : i32
    %c0_i32_1 = arith.constant 0 : i32
    return %c0_i32, %c0_i32_0 : i32, i32
  }
  func.func @transform_6(%arg0: i32) -> (i32, i32) {
    %c0_i32 = arith.constant 0 : i32
    %c0_i32_0 = arith.constant 0 : i32
    %c0_i32_1 = arith.constant 0 : i32
    return %c0_i32, %c0_i32_0 : i32, i32
  }
  func.func @transform_7(%arg0: i32) -> (i32, i32) {
    %c0_i32 = arith.constant 0 : i32
    %c0_i32_0 = arith.constant 0 : i32
    %c0_i32_1 = arith.constant 0 : i32
    return %c0_i32, %c0_i32_0 : i32, i32
  }
  func.func @transform_8(%arg0: i32) -> (i32, i32) {
    %c0_i32 = arith.constant 0 : i32
    %c0_i32_0 = arith.constant 0 : i32
    %c0_i32_1 = arith.constant 0 : i32
    return %c0_i32, %c0_i32_0 : i32, i32
  }
  func.func @transform_9(%arg0: i32) -> (i32, i32) {
    %c0_i32 = arith.constant 0 : i32
    %c0_i32_0 = arith.constant 0 : i32
    return %arg0, %c0_i32 : i32, i32
  }
}

</mosaic_0001>

<bundles_post_ra>
// kernel: densenet_forward.1
= control target key start
LH: loop header
LB: loop body
LE: loop exit
PB: predicated region body
PF: predicated region fallthrough
CT: control target
= control target key end

     0   :  { %s624_s30 = smov 0   ;;  %s856_s0 = inlined_call_operand.vmem [shape: f32[32,128], index: 0, kind: input, shape index: {}]   ;;  %s857_s1 = inlined_call_operand.vmem [shape: f32[128,128], index: 1, kind: input, shape index: {}]   ;;  %s858_s2 = inlined_call_operand.vmem [shape: f32[1,128], index: 2, kind: input, shape index: {}]   ;;  %s859_s3 = inlined_call_operand.vmem [shape: f32[128,128], index: 3, kind: input, shape index: {}]   ;;  %s860_s4 = inlined_call_operand.vmem [shape: f32[1,128], index: 4, kind: input, shape index: {}]   ;;  %s861_s5 = inlined_call_operand.vmem [shape: f32[128,128], index: 5, kind: input, shape index: {}]   ;;  %s862_s6 = inlined_call_operand.vmem [shape: f32[1,128], index: 6, kind: input, shape index: {}]   ;;  %s863_s7 = inlined_call_operand.vmem [shape: f32[128,128], index: 7, kind: input, shape index: {}]   ;;  %s864_s8 = inlined_call_operand.vmem [shape: f32[1,128], index: 8, kind: input, shape index: {}]   ;;  %s865_s9 = inlined_call_operand.vmem [shape: f32[32,128], index: 9, kind: output, shape index: {}]  }
   0x1 LB: > { %s545_s10 = sadd.s32 4294967295, %s572_s30   ;;  %p549_p0 = scmp.ge.s32.totalorder %s572_s30, 1  ;;  %s572_s30 = sphi %s624_s30, %s19_s30  }
   0x2   : > { %p286_p1 = scmp.lt.s32.totalorder %s572_s30, 5 }
   0x4   : > { %p287_p2 = pnand %p549_p0, %p286_p1 }
   0x5   : > { %p320_p3 = scmp.lt.s32.totalorder (!%p287_p2), %s545_s10, 3 }
   0x6   : > { %290 = sbr.rel (%p287_p2) target bundleno = 572 (0x23c), region = 56 }
   0xb   : > { %v344_v0 = vld [vmem:[%s857_s1 + $0x78] sm:$0xff]  ;;  %v343_v1 = vld [vmem:[%s857_s1 + $0x70] sm:$0xff]  ;;  %v342_v2 = vld [vmem:[%s857_s1 + $0x68] sm:$0xff]  ;;  %s867_s10 = smov (!%p320_p3, %s545_s10), 3 }
   0xc   : > { %349 = vmatpush.msra.mxu0 %v344_v0  ;;  %v341_v3 = vld [vmem:[%s857_s1 + $0x60] sm:$0xff]  ;;  %v385_v4 = vld [vmem:[%s859_s3 + $0x78] sm:$0xff]  ;;  %v384_v5 = vld [vmem:[%s859_s3 + $0x70] sm:$0xff]  ;;  %s550_s19 = sshll.u32 %s867_s10, 3 }
   0xd   : > { %v340_v6 = vld [vmem:[%s857_s1 + $0x58] sm:$0xff]  ;;  %390 = vmatpush.msra.mxu1 %v385_v4  ;;  %v383_v7 = vld [vmem:[%s859_s3 + $0x68] sm:$0xff]  ;;  %v339_v8 = vld [vmem:[%s857_s1 + $0x50] sm:$0xff]  ;;  %s323_s11 = scalar_lea.vmem %s856_s0, %s550_s19  ;;  %s327_s25 = scalar_lea.vmem %s865_s9, %s550_s19 }
   0xe   : > { %350 = vmatpush.msra.mxu0 %v343_v1  ;;  %v382_v9 = vld [vmem:[%s859_s3 + $0x60] sm:$0xff]  ;;  %v338_v10 = vld [vmem:[%s857_s1 + $0x48] sm:$0xff]  ;;  %v381_v11 = vld [vmem:[%s859_s3 + $0x58] sm:$0xff] }
   0xf   : > { %391 = vmatpush.msra.mxu1 %v384_v5  ;;  %v337_v12 = vld [vmem:[%s857_s1 + $0x40] sm:$0xff]  ;;  %v380_v13 = vld [vmem:[%s859_s3 + $0x50] sm:$0xff]  ;;  %v336_v14 = vld [vmem:[%s857_s1 + $0x38] sm:$0xff] }
  0x10   : > { %351 = vmatpush.msra.mxu0 %v342_v2  ;;  %v379_v15 = vld [vmem:[%s859_s3 + $0x48] sm:$0xff]  ;;  %v335_v16 = vld [vmem:[%s857_s1 + $0x30] sm:$0xff]  ;;  %v378_v17 = vld [vmem:[%s859_s3 + $0x40] sm:$0xff] }
  0x11   : > { %392 = vmatpush.msra.mxu1 %v383_v7  ;;  %v334_v18 = vld [vmem:[%s857_s1 + $0x28] sm:$0xff]  ;;  %v377_v19 = vld [vmem:[%s859_s3 + $0x38] sm:$0xff]  ;;  %v333_v20 = vld [vmem:[%s857_s1 + $0x20] sm:$0xff] }
  0x12   : > { %352 = vmatpush.msra.mxu0 %v341_v3  ;;  %v376_v21 = vld [vmem:[%s859_s3 + $0x30] sm:$0xff]  ;;  %v332_v22 = vld [vmem:[%s857_s1 + $0x18] sm:$0xff]  ;;  %v375_v23 = vld [vmem:[%s859_s3 + $0x28] sm:$0xff] }
  0x13   : > { %393 = vmatpush.msra.mxu1 %v382_v9  ;;  %v331_v24 = vld [vmem:[%s857_s1 + $0x10] sm:$0xff]  ;;  %v374_v25 = vld [vmem:[%s859_s3 + $0x20] sm:$0xff]  ;;  %v330_v26 = vld [vmem:[%s857_s1 + $0x8] sm:$0xff] }
  0x14   : > { %353 = vmatpush.msra.mxu0 %v340_v6  ;;  %v373_v27 = vld [vmem:[%s859_s3 + $0x18] sm:$0xff]  ;;  %v329_v28 = vld [vmem:[%s857_s1] sm:$0xff]  ;;  %v372_v30 = vld [vmem:[%s859_s3 + $0x10] sm:$0xff] }
  0x15   : > { %394 = vmatpush.msra.mxu1 %v381_v11  ;;  %v328_v29 = vld [vmem:[%s323_s11] sm:$0xff]  ;;  %v371_v31 = vld [vmem:[%s859_s3 + $0x8] sm:$0xff]  ;;  %v425_v33 = vld [vmem:[%s861_s5 + $0x78] sm:$0xff] }
  0x16   : > { %354 = vmatpush.msra.mxu0 %v339_v8  ;;  %v370_v32 = vld [vmem:[%s859_s3] sm:$0xff]  ;;  %v424_v34 = vld [vmem:[%s861_s5 + $0x70] sm:$0xff]  ;;  %430 = vmatpush.msra.mxu2 %v425_v33  ;;  %v423_v35 = vld [vmem:[%s861_s5 + $0x68] sm:$0xff] }
  0x17   : > { %395 = vmatpush.msra.mxu1 %v380_v13  ;;  %v422_v36 = vld [vmem:[%s861_s5 + $0x60] sm:$0xff]  ;;  %v421_v37 = vld [vmem:[%s861_s5 + $0x58] sm:$0xff]  ;;  %v420_v38 = vld [vmem:[%s861_s5 + $0x50] sm:$0xff] }
  0x18   : > { %355 = vmatpush.msra.mxu0 %v338_v10  ;;  %431 = vmatpush.msra.mxu2 %v424_v34  ;;  %v419_v39 = vld [vmem:[%s861_s5 + $0x48] sm:$0xff]  ;;  %v418_v40 = vld [vmem:[%s861_s5 + $0x40] sm:$0xff]  ;;  %v417_v41 = vld [vmem:[%s861_s5 + $0x38] sm:$0xff] }
  0x19   : > { %396 = vmatpush.msra.mxu1 %v379_v15  ;;  %v416_v42 = vld [vmem:[%s861_s5 + $0x30] sm:$0xff]  ;;  %v415_v43 = vld [vmem:[%s861_s5 + $0x28] sm:$0xff]  ;;  %v414_v44 = vld [vmem:[%s861_s5 + $0x20] sm:$0xff] }
  0x1a   : > { %356 = vmatpush.msra.mxu0 %v337_v12  ;;  %432 = vmatpush.msra.mxu2 %v423_v35  ;;  %v413_v45 = vld [vmem:[%s861_s5 + $0x18] sm:$0xff]  ;;  %v562_v46 = vld [vmem:[%s858_s2] ss:$0 sm:$0xff]  ;;  %v412_v47 = vld [vmem:[%s861_s5 + $0x10] sm:$0xff] }
  0x1b   : > { %397 = vmatpush.msra.mxu1 %v378_v17  ;;  %v411_v51 = vld [vmem:[%s861_s5 + $0x8] sm:$0xff]  ;;  %v410_v52 = vld [vmem:[%s861_s5] sm:$0xff]  ;;  %v466_v53 = vld [vmem:[%s863_s7 + $0x78] sm:$0xff] }
  0x1c   : > { %357 = vmatpush.msra.mxu0 %v336_v14  ;;  %433 = vmatpush.msra.mxu2 %v422_v36  ;;  %v465_v54 = vld [vmem:[%s863_s7 + $0x70] sm:$0xff]  ;;  %v464_v55 = vld [vmem:[%s863_s7 + $0x68] sm:$0xff]  ;;  %v463_v56 = vld [vmem:[%s863_s7 + $0x60] sm:$0xff] }
  0x1d   : > { %398 = vmatpush.msra.mxu1 %v377_v19  ;;  %471 = vmatpush.msra.mxu3 %v466_v53  ;;  %v462_v57 = vld [vmem:[%s863_s7 + $0x58] sm:$0xff]  ;;  %v461_v58 = vld [vmem:[%s863_s7 + $0x50] sm:$0xff]  ;;  %v460_v59 = vld [vmem:[%s863_s7 + $0x48] sm:$0xff] }
  0x1e   : > { %358 = vmatpush.msra.mxu0 %v335_v16  ;;  %434 = vmatpush.msra.mxu2 %v421_v37  ;;  %v459_v60 = vld [vmem:[%s863_s7 + $0x40] sm:$0xff]  ;;  %v458_v61 = vld [vmem:[%s863_s7 + $0x38] sm:$0xff]  ;;  %v457_v62 = vld [vmem:[%s863_s7 + $0x30] sm:$0xff] }
  0x1f   : > { %399 = vmatpush.msra.mxu1 %v376_v21  ;;  %472 = vmatpush.msra.mxu3 %v465_v54  ;;  %v456_v63 = vld [vmem:[%s863_s7 + $0x28] sm:$0xff]  ;;  %v455_v0 = vld [vmem:[%s863_s7 + $0x20] sm:$0xff]  ;;  %v454_v1 = vld [vmem:[%s863_s7 + $0x18] sm:$0xff] }
  0x20   : > { %359 = vmatpush.msra.mxu0 %v334_v18  ;;  %435 = vmatpush.msra.mxu2 %v420_v38  ;;  %v563_v2 = vld [vmem:[%s860_s4] ss:$0 sm:$0xff]  ;;  %v453_v5 = vld [vmem:[%s863_s7 + $0x10] sm:$0xff]  ;;  %v452_v6 = vld [vmem:[%s863_s7 + $0x8] sm:$0xff] }
  0x21   : > { %400 = vmatpush.msra.mxu1 %v375_v23  ;;  %473 = vmatpush.msra.mxu3 %v464_v55  ;;  %v451_v7 = vld [vmem:[%s863_s7] sm:$0xff] }
  0x22   : > { %360 = vmatpush.msra.mxu0 %v333_v20  ;;  %436 = vmatpush.msra.mxu2 %v419_v39  ;;  %v564_v8 = vld [vmem:[%s862_s6] ss:$0 sm:$0xff] }
  0x23   : > { %401 = vmatpush.msra.mxu1 %v374_v25  ;;  %474 = vmatpush.msra.mxu3 %v463_v56  ;;  %v565_v12 = vld [vmem:[%s864_s8] ss:$0 sm:$0xff] }
  0x24   : > { %361 = vmatpush.msra.mxu0 %v332_v22  ;;  %437 = vmatpush.msra.mxu2 %v418_v40 }
  0x25   : > { %402 = vmatpush.msra.mxu1 %v373_v27  ;;  %475 = vmatpush.msra.mxu3 %v462_v57 }
  0x26   : > { %362 = vmatpush.msra.mxu0 %v331_v24  ;;  %438 = vmatpush.msra.mxu2 %v417_v41 }
  0x27   : > { %403 = vmatpush.msra.mxu1 %v372_v30  ;;  %476 = vmatpush.msra.mxu3 %v461_v58 }
  0x28   : > { %363 = vmatpush.msra.mxu0 %v330_v26  ;;  %439 = vmatpush.msra.mxu2 %v416_v42 }
  0x29   : > { %404 = vmatpush.msra.mxu1 %v371_v31  ;;  %477 = vmatpush.msra.mxu3 %v460_v59 }
  0x2a   : > { %364 = vmatpush.msra.mxu0 %v329_v28  ;;  %440 = vmatpush.msra.mxu2 %v415_v43 }
  0x2b   : > { %365 = vmatmul.f32.vlgmr.msra.gmra.mxu0 %v328_v29  ;;  %405 = vmatpush.msra.mxu1 %v370_v32 }
  0x2c   : > { %441 = vmatpush.msra.mxu2 %v414_v44  ;;  %478 = vmatpush.msra.mxu3 %v459_v60 }
  0x2e   : > { %442 = vmatpush.msra.mxu2 %v413_v45  ;;  %479 = vmatpush.msra.mxu3 %v458_v61 }
  0x30   : > { %443 = vmatpush.msra.mxu2 %v412_v47  ;;  %480 = vmatpush.msra.mxu3 %v457_v62 }
  0x32   : > { %444 = vmatpush.msra.mxu2 %v411_v51  ;;  %481 = vmatpush.msra.mxu3 %v456_v63 }
  0x34   : > { %445 = vmatpush.msra.mxu2 %v410_v52  ;;  %482 = vmatpush.msra.mxu3 %v455_v0 }
  0x36   : > { %483 = vmatpush.msra.mxu3 %v454_v1 }
  0x38   : > { %484 = vmatpush.msra.mxu3 %v453_v5 }
  0x3a   : > { %485 = vmatpush.msra.mxu3 %v452_v6 }
  0x3c   : > { %486 = vmatpush.msra.mxu3 %v451_v7 }
  0xa8   : > { %v366_v48 = vpop.f32.mrf.mxu0 }
  0xa9   : > { %v367_v49 = vadd.f32 %v562_v46, %v366_v48 }
  0xab   : > { %v369_v50 = vmax.f32 %v367_v49, 0.0 }
  0xad   : > { %406 = vmatmul.f32.vlgmr.msra.gmra.mxu1 %v369_v50 }
 0x12a   : > { %v407_v3 = vpop.f32.mrf.mxu1 }
 0x12b   : > { %v408_v4 = vadd.f32 %v563_v2, %v407_v3 }
 0x12d   : > { %446 = vmatmul.f32.vlgmr.msra.gmra.mxu2 %v408_v4 }
 0x1b0   : > { %v447_v9 = vpop.f32.mrf.mxu2 }
 0x1b1   : > { %v448_v10 = vadd.f32 %v564_v8, %v447_v9 }
 0x1b3   : > { %v450_v11 = vmax.f32 %v448_v10, 0.0 }
 0x1b5   : > { %487 = vmatmul.f32.vlgmr.msra.gmra.mxu3 %v450_v11 }
 0x238   : > { %v488_v13 = vpop.f32.mrf.mxu3 }
 0x239   : > { %v489_v14 = vadd.f32 %v565_v12, %v488_v13 }
 0x23b   : > { %491 = vst [vmem:[%s327_s25] sm:$0xff] %v489_v14 }
 0x23c PF: > { %s19_s30 = sadd.s32 1, %s572_s30  }
 0x23d   : > { %p16_p4 = scmp.ge.s32.totalorder %s19_s30, 6  }
 0x23f   :  { %18 = sbr.rel (!%p16_p4) target bundleno = 1 (0x1), region = 86 }

</bundles_post_ra>
